<compile_context>
chip_gen: v6e
topology: v6e:2x2x1
jax: 0.10.0
libtpu: 0.0.40
codegen_flags: <defaults>
</compile_context>

<pallas_src>
import jax
import jax.numpy as jnp
from jax.experimental import pallas as pl
from jax.experimental.pallas import tpu as pltpu

_LANE = 128      # lane width
_SUBLANE = 8     # sublane width
_MAX_TM = 512    # row-tile cap (VMEM-safe on v7x, ~85% HBM roofline knee)


def _round_up(x, m):
    return ((x + m - 1) // m) * m


def _pad2(a, rows, cols):
    r, c = a.shape
    return jnp.pad(a, ((0, rows - r), (0, cols - c)))


def _prototypical_kernel(x_ref, w1_ref, b1_ref, w2_ref, b2_ref,
                         logits_ref, feat_ref):
    # Projector: Linear + LeakyReLU(0.2)
    x = x_ref[...]
    h = jnp.dot(x, w1_ref[...], preferred_element_type=jnp.float32) + b1_ref[...]
    h = jnp.where(h >= 0, h, 0.2 * h)

    # F.normalize(dim=1, p=2): x / max(||x||_2, 1e-12) == x * rsqrt(max(sumsq, 1e-24))
    # rsqrt runs on the EUP slot; removes sqrt+divide from the VALU path.
    sumsq = jnp.sum(h * h, axis=1, keepdims=True)
    inv = jax.lax.rsqrt(jnp.maximum(sumsq, 1e-24))
    feat = h * inv
    feat_ref[...] = feat.astype(feat_ref.dtype)

    # Classifier: Linear + LeakyReLU(0.2)
    logits = jnp.dot(feat, w2_ref[...], preferred_element_type=jnp.float32) + b2_ref[...]
    logits_ref[...] = jnp.where(logits >= 0, logits, 0.2 * logits).astype(logits_ref.dtype)


def _run_fused(x_p, w1_p, b1_p, w2_p, b2_p, *, tm):
    """All inputs are already zero-padded to lane/sublane friendly shapes."""
    n_p, d_in_p = x_p.shape
    d_c_p = w1_p.shape[1]
    d_cls_p = w2_p.shape[1]
    grid = (n_p // tm,)

    flops = 2 * n_p * (d_in_p * d_c_p + d_c_p * d_cls_p) + 6 * n_p * (d_c_p + d_cls_p)
    bytes_accessed = 4 * (x_p.size + w1_p.size + b1_p.size + w2_p.size + b2_p.size
                          + n_p * d_c_p + n_p * d_cls_p)
    cost = pl.CostEstimate(flops=flops, transcendentals=n_p,
                           bytes_accessed=bytes_accessed)

    return pl.pallas_call(
        _prototypical_kernel,
        out_shape=(
            jax.ShapeDtypeStruct((n_p, d_cls_p), jnp.float32),
            jax.ShapeDtypeStruct((n_p, d_c_p), jnp.float32),
        ),
        grid=grid,
        in_specs=[
            pl.BlockSpec((tm, d_in_p), lambda i: (i, 0)),      # x : row-tiled
            pl.BlockSpec((d_in_p, d_c_p), lambda i: (0, 0)),   # W1: resident
            pl.BlockSpec((1, d_c_p), lambda i: (0, 0)),        # b1: resident
            pl.BlockSpec((d_c_p, d_cls_p), lambda i: (0, 0)),  # W2: resident
            pl.BlockSpec((1, d_cls_p), lambda i: (0, 0)),      # b2: resident
        ],
        out_specs=(
            pl.BlockSpec((tm, d_cls_p), lambda i: (i, 0)),     # logits
            pl.BlockSpec((tm, d_c_p), lambda i: (i, 0)),       # features
        ),
        compiler_params=pltpu.CompilerParams(
            dimension_semantics=("parallel",),
            vmem_limit_bytes=64 * 1024 * 1024,
        ),
        cost_estimate=cost,
    )(x_p, w1_p, b1_p, w2_p, b2_p)


class PrototypicalPallas:
    """JAX/Pallas re-implementation of the PyTorch `Prototypical` module
    (Projector layer='single')."""

    def __init__(self, d_source, d_target, d_common, class_number, key):
        self.d_source = d_source
        self.d_target = d_target
        self.d_common = d_common
        self.class_number = class_number

        ks = jax.random.split(key, 6)
        std = 0.01
        # Unpadded parameters (nn.init.normal_(std=0.01)); weights pre-transposed.
        self.w_src_t = std * jax.random.normal(ks[0], (d_source, d_common), jnp.float32)
        self.b_src = std * jax.random.normal(ks[1], (1, d_common), jnp.float32)
        self.w_tgt_t = std * jax.random.normal(ks[2], (d_target, d_common), jnp.float32)
        self.b_tgt = std * jax.random.normal(ks[3], (1, d_common), jnp.float32)
        self.w_cls_t = std * jax.random.normal(ks[4], (d_common, class_number), jnp.float32)
        self.b_cls = std * jax.random.normal(ks[5], (1, class_number), jnp.float32)

        # Lane-padded (multiples of 128) copies used by the kernel. Zero
        # padding is inert: zero x-cols x zero W1-rows add nothing, padded
        # d_common cols stay exactly 0 through LeakyReLU/normalize, padded
        # class cols produce 0 logits and are sliced off.
        self.d_source_p = _round_up(d_source, _LANE)
        self.d_target_p = _round_up(d_target, _LANE)
        self.d_common_p = _round_up(d_common, _LANE)
        self.class_number_p = _round_up(class_number, _LANE)

        self.w_src_t_p = _pad2(self.w_src_t, self.d_source_p, self.d_common_p)
        self.b_src_p = _pad2(self.b_src, 1, self.d_common_p)
        self.w_tgt_t_p = _pad2(self.w_tgt_t, self.d_target_p, self.d_common_p)
        self.b_tgt_p = _pad2(self.b_tgt, 1, self.d_common_p)
        self.w_cls_t_p = _pad2(self.w_cls_t, self.d_common_p, self.class_number_p)
        self.b_cls_p = _pad2(self.b_cls, 1, self.class_number_p)

    def __call__(self, x):
        n, d = x.shape
        # Static shape-based dispatch, like the PyTorch forward.
        if d == self.d_source:
            w1_p, b1_p, d_in_p = self.w_src_t_p, self.b_src_p, self.d_source_p
        elif d == self.d_target:
            w1_p, b1_p, d_in_p = self.w_tgt_t_p, self.b_tgt_p, self.d_target_p
        else:
            raise Exception('Input data wrong dimension! ')

        # Row tile: keep tiny batches in one grid step, cap at 512 rows.
        tm = min(_MAX_TM, _round_up(n, _SUBLANE))
        n_p = _round_up(n, tm)
        x_p = jnp.pad(x.astype(jnp.float32), ((0, n_p - n), (0, d_in_p - d)))

        logits_p, feat_p = _run_fused(x_p, w1_p, b1_p,
                                      self.w_cls_t_p, self.b_cls_p, tm=tm)
        return logits_p[:n, :self.class_number], feat_p[:n, :self.d_common]


def _reference(x, w1_t, b1, w2_t, b2):
    h = x @ w1_t + b1
    h = jnp.where(h >= 0, h, 0.2 * h)
    feat = h / jnp.maximum(jnp.linalg.norm(h, axis=1, keepdims=True), 1e-12)
    logits = feat @ w2_t + b2
    logits = jnp.where(logits >= 0, logits, 0.2 * logits)
    return logits, feat


if __name__ == "__main__":
    key = jax.random.PRNGKey(0)
    k_model, k_src, k_tgt = jax.random.split(key, 3)

    d_source, d_target, d_common, class_number = 32, 48, 64, 8
    batch_src, batch_tgt = 8, 5   # 5 also exercises row padding / slicing

    model = PrototypicalPallas(d_source, d_target, d_common, class_number, k_model)

    # Source-domain input
    x_src = jax.random.normal(k_src, (batch_src, d_source), jnp.float32)
    logits_s, feat_s = model(x_src)
    jax.block_until_ready((logits_s, feat_s))

    # Target-domain input (exercises the other branch)
    x_tgt = jax.random.normal(k_tgt, (batch_tgt, d_target), jnp.float32)
    logits_t, feat_t = model(x_tgt)
    jax.block_until_ready((logits_t, feat_t))

    # Check against a pure-JAX reference (unpadded weights)
    ref_ls, ref_fs = _reference(x_src, model.w_src_t, model.b_src, model.w_cls_t, model.b_cls)
    ref_lt, ref_ft = _reference(x_tgt, model.w_tgt_t, model.b_tgt, model.w_cls_t, model.b_cls)
    assert logits_s.shape == (batch_src, class_number) and feat_s.shape == (batch_src, d_common)
    assert logits_t.shape == (batch_tgt, class_number) and feat_t.shape == (batch_tgt, d_common)
    assert jnp.allclose(logits_s, ref_ls, atol=2e-5), "source logits mismatch"
    assert jnp.allclose(feat_s, ref_fs, atol=2e-5), "source feature mismatch"
    assert jnp.allclose(logits_t, ref_lt, atol=2e-5), "target logits mismatch"
    assert jnp.allclose(feat_t, ref_ft, atol=2e-5), "target feature mismatch"

    print("KERNEL_OK")
</pallas_src>

<mosaic_0001>
module attributes {stable_mosaic.version = 11 : i64} {
  func.func @_prototypical_kernel(%arg0: i32, %arg1: memref<8x128xf32, #tpu.memory_space<vmem>>, %arg2: memref<128x128xf32, #tpu.memory_space<vmem>>, %arg3: memref<1x128xf32, #tpu.memory_space<vmem>>, %arg4: memref<128x128xf32, #tpu.memory_space<vmem>>, %arg5: memref<1x128xf32, #tpu.memory_space<vmem>>, %arg6: memref<8x128xf32, #tpu.memory_space<vmem>>, %arg7: memref<8x128xf32, #tpu.memory_space<vmem>>) attributes {dimension_semantics = [#tpu.dimension_semantics<parallel>], iteration_bounds = array<i64: 1>, scalar_prefetch = 0 : i64, scratch_operands = 0 : i64, tpu.core_type = #tpu.core_type<tc>, window_params = [{transform_indices = @transform_0, window_bounds = array<i64: 8, 128>}, {pipeline_mode = #tpu.pipeline_mode<synchronous>, transform_indices = @transform_1, window_bounds = array<i64: 128, 128>}, {pipeline_mode = #tpu.pipeline_mode<synchronous>, transform_indices = @transform_2, window_bounds = array<i64: 1, 128>}, {pipeline_mode = #tpu.pipeline_mode<synchronous>, transform_indices = @transform_3, window_bounds = array<i64: 128, 128>}, {pipeline_mode = #tpu.pipeline_mode<synchronous>, transform_indices = @transform_4, window_bounds = array<i64: 1, 128>}, {transform_indices = @transform_5, window_bounds = array<i64: 8, 128>}, {transform_indices = @transform_6, window_bounds = array<i64: 8, 128>}]} {
    %c0 = arith.constant 0 : index
    %c0_0 = arith.constant 0 : index
    %0 = vector.load %arg1[%c0, %c0_0] : memref<8x128xf32, #tpu.memory_space<vmem>>, vector<8x128xf32>
    %c0_1 = arith.constant 0 : index
    %c0_2 = arith.constant 0 : index
    %1 = vector.load %arg2[%c0_1, %c0_2] : memref<128x128xf32, #tpu.memory_space<vmem>>, vector<128x128xf32>
    %cst = arith.constant dense<0.000000e+00> : vector<8x128xf32>
    %2 = tpu.matmul %0, %1, %cst {dimension_numbers = #tpu.dot_dimension_numbers<[1], [0], [0], [1], [0, 0, 1, 1], [], []>} : vector<8x128xf32>, vector<128x128xf32>, vector<8x128xf32> -> vector<8x128xf32>
    %c0_3 = arith.constant 0 : index
    %c0_4 = arith.constant 0 : index
    %3 = vector.load %arg3[%c0_3, %c0_4] : memref<1x128xf32, #tpu.memory_space<vmem>>, vector<1x128xf32>
    %4 = vector.broadcast %3 : vector<1x128xf32> to vector<8x128xf32>
    %5 = arith.addf %2, %4 : vector<8x128xf32>
    %cst_5 = arith.constant 0.000000e+00 : f32
    %6 = vector.broadcast %cst_5 : f32 to vector<8x128xf32>
    %7 = arith.cmpf oge, %5, %6 : vector<8x128xf32>
    %cst_6 = arith.constant 2.000000e-01 : f32
    %8 = vector.broadcast %cst_6 : f32 to vector<8x128xf32>
    %9 = arith.mulf %8, %5 : vector<8x128xf32>
    %10 = arith.select %7, %5, %9 : vector<8x128xi1>, vector<8x128xf32>
    %11 = arith.mulf %10, %10 : vector<8x128xf32>
    %cst_7 = arith.constant dense<0.000000e+00> : vector<8xf32>
    %12 = vector.multi_reduction <add>, %11, %cst_7 [1] : vector<8x128xf32> to vector<8xf32>
    %13 = vector.shape_cast %12 : vector<8xf32> to vector<8x1xf32>
    %cst_8 = arith.constant 1.000000e-24 : f32
    %14 = vector.broadcast %cst_8 : f32 to vector<8x1xf32>
    %15 = arith.maximumf %13, %14 : vector<8x1xf32>
    %16 = math.rsqrt %15 : vector<8x1xf32>
    %17 = vector.broadcast %16 : vector<8x1xf32> to vector<8x128xf32>
    %18 = arith.mulf %10, %17 : vector<8x128xf32>
    %c0_9 = arith.constant 0 : index
    %c0_10 = arith.constant 0 : index
    %19 = vector.load %arg7[%c0_9, %c0_10] : memref<8x128xf32, #tpu.memory_space<vmem>>, vector<8x128xf32>
    tpu.vector_store %arg7[%c0_9, %c0_10], %18 {strides = array<i32>} : memref<8x128xf32, #tpu.memory_space<vmem>>, vector<8x128xf32>,
    %c0_11 = arith.constant 0 : index
    %c0_12 = arith.constant 0 : index
    %20 = vector.load %arg4[%c0_11, %c0_12] : memref<128x128xf32, #tpu.memory_space<vmem>>, vector<128x128xf32>
    %cst_13 = arith.constant dense<0.000000e+00> : vector<8x128xf32>
    %21 = tpu.matmul %18, %20, %cst_13 {dimension_numbers = #tpu.dot_dimension_numbers<[1], [0], [0], [1], [0, 0, 1, 1], [], []>} : vector<8x128xf32>, vector<128x128xf32>, vector<8x128xf32> -> vector<8x128xf32>
    %c0_14 = arith.constant 0 : index
    %c0_15 = arith.constant 0 : index
    %22 = vector.load %arg5[%c0_14, %c0_15] : memref<1x128xf32, #tpu.memory_space<vmem>>, vector<1x128xf32>
    %23 = vector.broadcast %22 : vector<1x128xf32> to vector<8x128xf32>
    %24 = arith.addf %21, %23 : vector<8x128xf32>
    %cst_16 = arith.constant 0.000000e+00 : f32
    %25 = vector.broadcast %cst_16 : f32 to vector<8x128xf32>
    %26 = arith.cmpf oge, %24, %25 : vector<8x128xf32>
    %cst_17 = arith.constant 2.000000e-01 : f32
    %27 = vector.broadcast %cst_17 : f32 to vector<8x128xf32>
    %28 = arith.mulf %27, %24 : vector<8x128xf32>
    %29 = arith.select %26, %24, %28 : vector<8x128xi1>, vector<8x128xf32>
    %c0_18 = arith.constant 0 : index
    %c0_19 = arith.constant 0 : index
    %30 = vector.load %arg6[%c0_18, %c0_19] : memref<8x128xf32, #tpu.memory_space<vmem>>, vector<8x128xf32>
    tpu.vector_store %arg6[%c0_18, %c0_19], %29 {strides = array<i32>} : memref<8x128xf32, #tpu.memory_space<vmem>>, vector<8x128xf32>,
    return
  }
  func.func @transform_0(%arg0: i32) -> (i32, i32) {
    %c0_i32 = arith.constant 0 : i32
    %c0_i32_0 = arith.constant 0 : i32
    return %arg0, %c0_i32 : i32, i32
  }
  func.func @transform_1(%arg0: i32) -> (i32, i32) {
    %c0_i32 = arith.constant 0 : i32
    %c0_i32_0 = arith.constant 0 : i32
    %c0_i32_1 = arith.constant 0 : i32
    return %c0_i32, %c0_i32_0 : i32, i32
  }
  func.func @transform_2(%arg0: i32) -> (i32, i32) {
    %c0_i32 = arith.constant 0 : i32
    %c0_i32_0 = arith.constant 0 : i32
    %c0_i32_1 = arith.constant 0 : i32
    return %c0_i32, %c0_i32_0 : i32, i32
  }
  func.func @transform_3(%arg0: i32) -> (i32, i32) {
    %c0_i32 = arith.constant 0 : i32
    %c0_i32_0 = arith.constant 0 : i32
    %c0_i32_1 = arith.constant 0 : i32
    return %c0_i32, %c0_i32_0 : i32, i32
  }
  func.func @transform_4(%arg0: i32) -> (i32, i32) {
    %c0_i32 = arith.constant 0 : i32
    %c0_i32_0 = arith.constant 0 : i32
    %c0_i32_1 = arith.constant 0 : i32
    return %c0_i32, %c0_i32_0 : i32, i32
  }
  func.func @transform_5(%arg0: i32) -> (i32, i32) {
    %c0_i32 = arith.constant 0 : i32
    %c0_i32_0 = arith.constant 0 : i32
    return %arg0, %c0_i32 : i32, i32
  }
  func.func @transform_6(%arg0: i32) -> (i32, i32) {
    %c0_i32 = arith.constant 0 : i32
    %c0_i32_0 = arith.constant 0 : i32
    return %arg0, %c0_i32 : i32, i32
  }
}

</mosaic_0001>

<bundles_post_ra>
// kernel: tpu_custom_call.1
= control target key start
LH: loop header
LB: loop body
LE: loop exit
PB: predicated region body
PF: predicated region fallthrough
CT: control target
= control target key end

     0   :  { %12 = vsyncpa [#allocation3], 0  ;;  %s618_s0 = inlined_call_operand.hbm [shape: f32[8,128], index: 0, kind: input, shape index: {}]   ;;  %s619_s1 = inlined_call_operand.hbm [shape: f32[128,128], index: 1, kind: input, shape index: {}]   ;;  %s620_s2 = inlined_call_operand.vmem [shape: f32[1,128], index: 2, kind: input, shape index: {}]   ;;  %s621_s3 = inlined_call_operand.hbm [shape: f32[128,128], index: 3, kind: input, shape index: {}]   ;;  %s622_s4 = inlined_call_operand.vmem [shape: f32[1,128], index: 4, kind: input, shape index: {}]   ;;  %s623_s5 = inlined_call_operand.hbm [shape: f32[8,128], index: 5, kind: output, shape index: {0}]   ;;  %s624_s6 = inlined_call_operand.hbm [shape: f32[8,128], index: 6, kind: output, shape index: {1}]  }
   0x1   :  { %13 = vsyncpa [#allocation6], 0 }
   0x2   :  { %14 = vsyncpa [#allocation4], 0 }
   0x3   :  { %15 = vsyncpa [#allocation10], 0  ;;  %s519_s21 = smov [#allocation5]  }
   0x4   :  { %s31_s22 = sshll.u32 %s519_s21, 4  ;;  %s32_s22 = int_to_ptr.vmem [resolvable:$true] %s31_s22 }
   0x5   :  { %s419_s23 = scalar_lea.vmem %s32_s22, 2048  ;;  %p424_p1 = scmp.lt.s32.totalorder %s32_s22, %s32_s22 }
   0x6   :  { %p420_p0 = scmp.ne.s32.totalorder %s32_s22, %s419_s23  ;;  %p425_p2 = scmp.lt.s32.totalorder %s419_s23, %s419_s23 }
   0x8   :  { %p426_p3 = por %p425_p2, %p424_p1 }
   0xa   :  { %p427_p4 = pnand %p426_p3, %p420_p0 }
   0xc   :  { %430 = shalt.err (!%p427_p4)
}
   0xd   :  { %s520_s24 = smov 128   ;;  %s521_s25 = smov 8  }
   0xe   :  { %37 = dma.hbm_to_vmem [thread:$0]  %s619_s1, 2048, %s32_s22, [#allocation6], %s520_s24, %s520_s24, %s521_s25  }
   0xf   :  { %s522_s28 = smov [#allocation2]   ;;  %s523_s30 = smov [#allocation7]  }
  0x10   :  { %s22_s29 = sshll.u32 %s522_s28, 4  ;;  %s45_s7 = sshll.u32 %s523_s30, 4  ;;  %s23_s29 = int_to_ptr.vmem [resolvable:$true] %s22_s29  ;;  %s46_s7 = int_to_ptr.vmem [resolvable:$true] %s45_s7 }
  0x11   :  { %s439_s8 = scalar_lea.vmem %s23_s29, 128  ;;  %p444_p6 = scmp.lt.s32.totalorder %s23_s29, %s23_s29 }
  0x12   :  { %p440_p5 = scmp.ne.s32.totalorder %s23_s29, %s439_s8  ;;  %p445_p7 = scmp.lt.s32.totalorder %s439_s8, %s439_s8 }
  0x14   :  { %p446_p8 = por %p445_p7, %p444_p6 }
  0x16   :  { %p447_p9 = pnand %p446_p8, %p440_p5 }
  0x18   :  { %450 = shalt.err (!%p447_p9)
}
  0x19   :  { %25 = dma.hbm_to_vmem [thread:$0]  %s618_s0, 128, %s23_s29, [#allocation3]  }
  0x1a   :  { %s459_s11 = scalar_lea.vmem %s46_s7, 2048  ;;  %p464_p11 = scmp.lt.s32.totalorder %s46_s7, %s46_s7 }
  0x1b   :  { %p460_p10 = scmp.ne.s32.totalorder %s46_s7, %s459_s11  ;;  %p465_p12 = scmp.lt.s32.totalorder %s459_s11, %s459_s11 }
  0x1d   :  { %p466_p13 = por %p465_p12, %p464_p11 }
  0x1f   :  { %p467_p0 = pnand %p466_p13, %p460_p10 }
  0x21   :  { %470 = shalt.err (!%p467_p0)
}
  0x22   :  { %51 = dma.hbm_to_vmem [thread:$0]  %s621_s3, 2048, %s46_s7, [#allocation6], %s520_s24, %s520_s24, %s521_s25  }
  0x23   :  { %511 = dma.done.wait [#allocation3], 128  }
  0x24   :  { %512 = vsyncadd [#allocation3], 4294967168 }
  0x25   :  { %513 = dma.done.wait [#allocation6], 4096  }
  0x26   :  { %514 = vsyncadd [#allocation6], 4294963200  ;;  %v524_v0 = vmov 0.0   ;;  %vm525_vm0 = vmmov 0   ;;  %v79_v1 = vld [vmem:[#allocation5 + $0x78] sm:$0xff]  ;;  %v78_v2 = vld [vmem:[#allocation5 + $0x70] sm:$0xff] }
  0x27   :  { %330 = vmatprep.subr.mxu0 %v524_v0  ;;  %362 = vmatprep.mubr.msk.f32.mxu0 %vm525_vm0, %v524_v0  ;;  %v77_v3 = vld [vmem:[#allocation5 + $0x68] sm:$0xff]  ;;  %v76_v4 = vld [vmem:[#allocation5 + $0x60] sm:$0xff]  ;;  %v75_v5 = vld [vmem:[#allocation5 + $0x58] sm:$0xff] }
  0x28   :  { %365 = vmatprep.subr.mxu1 %v524_v0  ;;  %397 = vmatprep.mubr.msk.f32.mxu1 %vm525_vm0, %v524_v0  ;;  %v74_v6 = vld [vmem:[#allocation5 + $0x50] sm:$0xff]  ;;  %v73_v7 = vld [vmem:[#allocation5 + $0x48] sm:$0xff]  ;;  %v72_v8 = vld [vmem:[#allocation5 + $0x40] sm:$0xff] }
  0x29   :  { %331 = vmatpush3.msra.mxu0 %v79_v1  ;;  %v71_v9 = vld [vmem:[#allocation5 + $0x38] sm:$0xff]  ;;  %v70_v10 = vld [vmem:[#allocation5 + $0x30] sm:$0xff]  ;;  %v69_v11 = vld [vmem:[#allocation5 + $0x28] sm:$0xff] }
  0x2a   :  { %332 = vmatprep.subr.mxu0 %v524_v0  ;;  %v68_v12 = vld [vmem:[#allocation5 + $0x20] sm:$0xff]  ;;  %v67_v13 = vld [vmem:[#allocation5 + $0x18] sm:$0xff]  ;;  %v66_v14 = vld [vmem:[#allocation5 + $0x10] sm:$0xff] }
  0x2b   :  { %333 = vmatpush3.msra.mxu0 %v78_v2  ;;  %v65_v15 = vld [vmem:[#allocation5 + $0x8] sm:$0xff]  ;;  %v64_v16 = vld [vmem:[#allocation5] sm:$0xff]  ;;  %v63_v17 = vld [vmem:[#allocation2] sm:$0xff] }
  0x2c   :  { %334 = vmatprep.subr.mxu0 %v524_v0  ;;  %v182_v18 = vld [vmem:[#allocation7 + $0x78] sm:$0xff]  ;;  %v181_v19 = vld [vmem:[#allocation7 + $0x70] sm:$0xff]  ;;  %v180_v20 = vld [vmem:[#allocation7 + $0x68] sm:$0xff] }
  0x2d   :  { %335 = vmatpush3.msra.mxu0 %v77_v3  ;;  %366 = vmatpush3.msra.mxu1 %v182_v18  ;;  %v179_v21 = vld [vmem:[#allocation7 + $0x60] sm:$0xff]  ;;  %v178_v22 = vld [vmem:[#allocation7 + $0x58] sm:$0xff]  ;;  %v177_v23 = vld [vmem:[#allocation7 + $0x50] sm:$0xff] }
  0x2e   :  { %336 = vmatprep.subr.mxu0 %v524_v0  ;;  %367 = vmatprep.subr.mxu1 %v524_v0  ;;  %v294_v24 = vld [vmem:[%s620_s2] ss:$0 sm:$0xff]  ;;  %v176_v31 = vld [vmem:[#allocation7 + $0x48] sm:$0xff]  ;;  %v175_v32 = vld [vmem:[#allocation7 + $0x40] sm:$0xff]  ;;  %s526_s2 = smov [#allocation9]  }
  0x2f   :  { %337 = vmatpush3.msra.mxu0 %v76_v4  ;;  %368 = vmatpush3.msra.mxu1 %v181_v19  ;;  %v174_v33 = vld [vmem:[#allocation7 + $0x38] sm:$0xff]  ;;  %v173_v34 = vld [vmem:[#allocation7 + $0x30] sm:$0xff]  ;;  %v172_v35 = vld [vmem:[#allocation7 + $0x28] sm:$0xff]  ;;  %s280_s13 = sshll.u32 %s526_s2, 4  ;;  %s281_s13 = int_to_ptr.vmem [resolvable:$true] %s280_s13 }
  0x30   :  { %338 = vmatprep.subr.mxu0 %v524_v0  ;;  %369 = vmatprep.subr.mxu1 %v524_v0  ;;  %v171_v36 = vld [vmem:[#allocation7 + $0x20] sm:$0xff]  ;;  %v170_v37 = vld [vmem:[#allocation7 + $0x18] sm:$0xff]  ;;  %v169_v38 = vld [vmem:[#allocation7 + $0x10] sm:$0xff]  ;;  %s471_s14 = scalar_lea.vmem %s281_s13, 128  ;;  %p476_p2 = scmp.lt.s32.totalorder %s281_s13, %s281_s13 }
  0x31   :  { %339 = vmatpush3.msra.mxu0 %v75_v5  ;;  %370 = vmatpush3.msra.mxu1 %v180_v20  ;;  %v168_v39 = vld [vmem:[#allocation7 + $0x8] sm:$0xff]  ;;  %v167_v40 = vld [vmem:[#allocation7] sm:$0xff]  ;;  %p472_p1 = scmp.ne.s32.totalorder %s281_s13, %s471_s14  ;;  %p477_p3 = scmp.lt.s32.totalorder %s471_s14, %s471_s14 }
  0x32   :  { %340 = vmatprep.subr.mxu0 %v524_v0  ;;  %371 = vmatprep.subr.mxu1 %v524_v0 }
  0x33   :  { %341 = vmatpush3.msra.mxu0 %v74_v6  ;;  %372 = vmatpush3.msra.mxu1 %v179_v21  ;;  %p478_p4 = por %p477_p3, %p476_p2 }
  0x34   :  { %342 = vmatprep.subr.mxu0 %v524_v0  ;;  %373 = vmatprep.subr.mxu1 %v524_v0 }
  0x35   :  { %343 = vmatpush3.msra.mxu0 %v73_v7  ;;  %374 = vmatpush3.msra.mxu1 %v178_v22  ;;  %p479_p5 = pnand %p478_p4, %p472_p1 }
  0x36   :  { %344 = vmatprep.subr.mxu0 %v524_v0  ;;  %375 = vmatprep.subr.mxu1 %v524_v0 }
  0x37   :  { %345 = vmatpush3.msra.mxu0 %v72_v8  ;;  %376 = vmatpush3.msra.mxu1 %v177_v23 }
  0x38   :  { %346 = vmatprep.subr.mxu0 %v524_v0  ;;  %377 = vmatprep.subr.mxu1 %v524_v0 }
  0x39   :  { %347 = vmatpush3.msra.mxu0 %v71_v9  ;;  %378 = vmatpush3.msra.mxu1 %v176_v31 }
  0x3a   :  { %348 = vmatprep.subr.mxu0 %v524_v0  ;;  %379 = vmatprep.subr.mxu1 %v524_v0 }
  0x3b   :  { %349 = vmatpush3.msra.mxu0 %v70_v10  ;;  %380 = vmatpush3.msra.mxu1 %v175_v32 }
  0x3c   :  { %350 = vmatprep.subr.mxu0 %v524_v0  ;;  %381 = vmatprep.subr.mxu1 %v524_v0 }
  0x3d   :  { %351 = vmatpush3.msra.mxu0 %v69_v11  ;;  %382 = vmatpush3.msra.mxu1 %v174_v33 }
  0x3e   :  { %352 = vmatprep.subr.mxu0 %v524_v0  ;;  %383 = vmatprep.subr.mxu1 %v524_v0 }
  0x3f   :  { %353 = vmatpush3.msra.mxu0 %v68_v12  ;;  %384 = vmatpush3.msra.mxu1 %v173_v34 }
  0x40   :  { %354 = vmatprep.subr.mxu0 %v524_v0  ;;  %385 = vmatprep.subr.mxu1 %v524_v0 }
  0x41   :  { %355 = vmatpush3.msra.mxu0 %v67_v13  ;;  %386 = vmatpush3.msra.mxu1 %v172_v35 }
  0x42   :  { %356 = vmatprep.subr.mxu0 %v524_v0  ;;  %387 = vmatprep.subr.mxu1 %v524_v0 }
  0x43   :  { %357 = vmatpush3.msra.mxu0 %v66_v14  ;;  %388 = vmatpush3.msra.mxu1 %v171_v36 }
  0x44   :  { %358 = vmatprep.subr.mxu0 %v524_v0  ;;  %389 = vmatprep.subr.mxu1 %v524_v0 }
  0x45   :  { %359 = vmatpush3.msra.mxu0 %v65_v15  ;;  %390 = vmatpush3.msra.mxu1 %v170_v37 }
  0x46   :  { %360 = vmatprep.subr.mxu0 %v524_v0  ;;  %391 = vmatprep.subr.mxu1 %v524_v0 }
  0x47   :  { %361 = vmatpush3.msra.mxu0 %v64_v16  ;;  %392 = vmatpush3.msra.mxu1 %v169_v38 }
  0x48   :  { %363 = vmatmul.mubr.f32.vlgmr.msra.gmra.mxu0 %v63_v17  ;;  %393 = vmatprep.subr.mxu1 %v524_v0 }
  0x49   :  { %394 = vmatpush3.msra.mxu1 %v168_v39 }
  0x4a   :  { %395 = vmatprep.subr.mxu1 %v524_v0 }
  0x4b   :  { %396 = vmatpush3.msra.mxu1 %v167_v40 }
 0x108   :  { %v153_v25 = vpop.f32.mrf.mxu0 }
 0x109   :  { %v154_v26 = vadd.f32 %v294_v24, %v153_v25 }
 0x10a   :  { %v364_v27 = vpop.f32.mrf.mxu0 }
 0x10b   :  { %v158_v28 = vmul.f32 0.2, %v154_v26  ;;  %vm157_vm1 = vcmp.ge.f32.partialorder %v154_v26, 0.0 }
 0x10d   :  { %v159_v29 = vsel %vm157_vm1, %v154_v26, %v158_v28 }
 0x10e   :  { %v160_v30 = vmul.f32 %v159_v29, %v159_v29 }
 0x110   :  { %161 = vadd.xlane.f32.xlu0 %v160_v30 }
 0x199   :  { %v162_v41 = vpop.xlane.xlu0 %161 }
 0x19a   :  { %v163_v42 = vmax.f32 %v162_v41, 1e-24 }
 0x19c   :  { %409 = vrsqrt.f32 %v163_v42 }
 0x1a9   :  { %v410_v43 = vpop.eup %409 }
 0x1aa   :  { %v165_v44 = vmul.f32 %v410_v43, %v159_v29 }
 0x1ac   :  { %398 = vmatmul.mubr.f32.vlgmr.msra.gmra.mxu1 %v165_v44  ;;  %166 = vst [vmem:[#allocation9] sm:$0xff] %v165_v44 }
 0x1ad   :  { %482 = shalt.err (!%p479_p5)
}
 0x1ae   :  { %283 = dma.vmem_to_hbm [thread:$0]  %s281_s13, 128, %s624_s6, [#allocation10]   ;;  %v295_v45 = vld [vmem:[%s622_s4] ss:$0 sm:$0xff] }
 0x1af   :  { %s527_s19 = smov [#allocation8]  }
 0x1b0   :  { %s270_s20 = sshll.u32 %s527_s19, 4  ;;  %s271_s20 = int_to_ptr.vmem [resolvable:$true] %s270_s20 }
 0x1b1   :  { %s491_s21 = scalar_lea.vmem %s271_s20, 128  ;;  %p496_p7 = scmp.lt.s32.totalorder %s271_s20, %s271_s20 }
 0x1b2   :  { %p492_p6 = scmp.ne.s32.totalorder %s271_s20, %s491_s21  ;;  %p497_p8 = scmp.lt.s32.totalorder %s491_s21, %s491_s21 }
 0x1b4   :  { %p498_p9 = por %p497_p8, %p496_p7 }
 0x1b6   :  { %p499_p10 = pnand %p498_p9, %p492_p6 }
 0x26c   :  { %v256_v46 = vpop.f32.mrf.mxu1 }
 0x26d   :  { %v257_v47 = vadd.f32 %v295_v45, %v256_v46 }
 0x26e   :  { %v399_v48 = vpop.f32.mrf.mxu1 }
 0x26f   :  { %v261_v49 = vmul.f32 0.2, %v257_v47  ;;  %vm260_vm2 = vcmp.ge.f32.partialorder %v257_v47, 0.0 }
 0x271   :  { %v262_v50 = vsel %vm260_vm2, %v257_v47, %v261_v49 }
 0x272   :  { %263 = vst [vmem:[#allocation8] sm:$0xff] %v262_v50 }
 0x273   :  { %502 = shalt.err (!%p499_p10)
}
 0x274   :  { %273 = dma.vmem_to_hbm [thread:$0]  %s271_s20, 128, %s623_s5, [#allocation4]  }
 0x275   :  { %515 = dma.done.wait [#allocation4], 128  }
 0x276   :  { %516 = vsyncadd [#allocation4], 4294967168 }
 0x277   :  { %517 = dma.done.wait [#allocation10], 128  }
 0x278   :  { %518 = vsyncadd [#allocation10], 4294967168 }
 0x279   :  { %290 = vsyncpa [#allocation3], 1 }
 0x27a   :  { %291 = vsyncpa [#allocation6], 1 }
 0x27b   :  { %292 = vsyncpa [#allocation4], 1 }
 0x27c   :  { %293 = vsyncpa [#allocation10], 1 }

</bundles_post_ra>
